<compile_context>
chip_gen: v7x
topology: tpu7x:2x2x1
jax: 0.10.0
libtpu: 0.0.40
codegen_flags: <defaults>
</compile_context>

<pallas_src>
import jax
import jax.numpy as jnp
from jax import lax
from jax.experimental import pallas as pl
from jax.experimental.pallas import tpu as pltpu


def _round_up(x, m):
    return ((x + m - 1) // m) * m


def _sentiment_kernel(text_ref, emb_t_ref, w_ref, bias_ref, out_ref):
    # text_ref  : VMEM (TB, S)      int32 token ids (one bag per row)
    # emb_t_ref : VMEM (E, V)       f32, embedding table transposed (vocab on lanes)
    # w_ref     : VMEM (E, O_pad)   f32, fc weight transposed + lane-padded
    # bias_ref  : VMEM (1, O_pad)   f32
    # out_ref   : VMEM (TB, O_pad)  f32 output block for this batch tile
    tokens = text_ref[...]                                   # (TB, S)
    emb_t = emb_t_ref[...]                                   # (E, V)
    tb, seq = tokens.shape
    vocab = emb_t_ref.shape[1]

    # Membership mask over the vocab axis: member[b, v] == True iff token v appears in bag b.
    # S is small and static -> unrolled, S independent (TB, V) compares (no serial dependency).
    vocab_ids = lax.broadcasted_iota(jnp.int32, (tb, vocab), 1)     # (TB, V)
    member = tokens[:, 0:1] == vocab_ids
    for s in range(1, seq):
        member = jnp.logical_or(member, tokens[:, s:s+1] == vocab_ids)

    # EmbeddingBag 'max': masked max over vocab rows present in each bag.  Lane-axis reduce,
    # all TB bags at once -> (TB, E) bag maxima.
    neg_inf = jnp.float32(-jnp.inf)
    masked = jnp.where(member[:, None, :], emb_t[None, :, :], neg_inf)   # (TB, E, V)
    bag = jnp.max(masked, axis=-1)                                       # (TB, E)

    # Linear: one MXU matmul + lane-dense bias add / store per tile.
    out = jnp.dot(bag, w_ref[...], preferred_element_type=jnp.float32)   # (TB, O_pad)
    out_ref[...] = (out + bias_ref[...]).astype(out_ref.dtype)


def text_sentiment_linear(text, emb_table, w_t, bias, *, block_batch=128):
    """text: (B, S) int; emb_table: (V, E); w_t: (E, O); bias: (1, O) -> (B, O) float32."""
    assert block_batch % 8 == 0
    batch, seq = text.shape
    vocab, embed_dim = emb_table.shape
    out_size = w_t.shape[1]

    # Clamp token ids (documented divergence: PyTorch raises on out-of-range ids; here they are
    # mapped to valid rows so the in-kernel membership mask always has >= 1 hit per bag).
    text = jnp.clip(text.astype(jnp.int32), 0, vocab - 1)

    # Lane-dense output: pad out_size up to a multiple of 128 lanes (full vst, dense writeback).
    o_pad = _round_up(out_size, 128)
    w_pad = jnp.pad(w_t.astype(jnp.float32), ((0, 0), (0, o_pad - out_size)))
    b_pad = jnp.pad(bias.astype(jnp.float32).reshape(1, -1), ((0, 0), (0, o_pad - out_size)))

    # Table transposed so vocab sits on the lane axis inside the kernel (masked max = lane reduce).
    emb_t = emb_table.astype(jnp.float32).T                   # (E, V)

    # Batch tiling: TB multiple of 8 sublanes; guarantee >= 2 tiles when possible so the
    # "parallel" batch axis can shard across both v7x TensorCores.
    tb = min(block_batch, _round_up(batch, 8))
    padded_batch = _round_up(batch, tb)
    n_tiles = padded_batch // tb
    if n_tiles == 1 and tb % 16 == 0:
        tb //= 2
        n_tiles = 2
    if padded_batch != batch:
        text = jnp.pad(text, ((0, padded_batch - batch), (0, 0)))   # pad rows use token 0 -> sliced off

    grid_spec = pltpu.PrefetchScalarGridSpec(
        num_scalar_prefetch=0,
        grid=(n_tiles,),
        in_specs=[
            pl.BlockSpec((tb, seq), lambda t: (t, 0)),                 # token ids (VMEM int32)
            pl.BlockSpec((embed_dim, vocab), lambda t: (0, 0)),        # whole transposed table (constant block)
            pl.BlockSpec((embed_dim, o_pad), lambda t: (0, 0)),        # fc weight (transposed, lane-padded)
            pl.BlockSpec((1, o_pad), lambda t: (0, 0)),                # fc bias (lane-padded)
        ],
        out_specs=pl.BlockSpec((tb, o_pad), lambda t: (t, 0)),
    )

    # Raise the scoped-VMEM limit only if the resident constant blocks get large (v5e default 16 MiB).
    compiler_kwargs = dict(dimension_semantics=("parallel",))
    resident_bytes = 2 * 4 * (vocab * embed_dim + embed_dim * o_pad + o_pad)
    if resident_bytes > (12 << 20):
        compiler_kwargs["vmem_limit_bytes"] = min(resident_bytes + (16 << 20), 100 << 20)

    out = pl.pallas_call(
        _sentiment_kernel,
        grid_spec=grid_spec,
        out_shape=jax.ShapeDtypeStruct((padded_batch, o_pad), jnp.float32),
        compiler_params=pltpu.CompilerParams(**compiler_kwargs),
    )(text, emb_t, w_pad, b_pad)

    return out[:batch, :out_size]


def _reference(text, emb_table, w_t, bias):
    # pure-JAX reference of the PyTorch forward
    gathered = emb_table[text]                     # (B, S, E)
    embedded = jnp.max(gathered, axis=1)           # EmbeddingBag 'max'
    return embedded @ w_t + bias                   # Linear


if __name__ == "__main__":
    # module hyperparameters (small, consistent with the forward pass)
    vocab_size, embed_dim, out_size = 64, 32, 8
    batch, seq = 2, 8

    key = jax.random.PRNGKey(0)
    k_emb, k_w, k_txt = jax.random.split(key, 3)

    # deterministic init mimicking init_weights():
    #   embedding.weight ~ U(-0.5, 0.5), row 1 zeroed; fc.weight ~ U(-0.5, 0.5); fc.bias = 0
    initrange = 0.5
    emb_table = jax.random.uniform(k_emb, (vocab_size, embed_dim), jnp.float32,
                                   -initrange, initrange)
    emb_table = emb_table.at[1].set(0.0)
    fc_weight = jax.random.uniform(k_w, (out_size, embed_dim), jnp.float32,
                                   -initrange, initrange)
    fc_bias = jnp.zeros((out_size,), jnp.float32)

    w_t = fc_weight.T                              # (embed_dim, out_size)
    bias2d = fc_bias.reshape(1, out_size)

    text = jax.random.randint(k_txt, (batch, seq), 0, vocab_size, dtype=jnp.int32)

    out = text_sentiment_linear(text, emb_table, w_t, bias2d)
    out = jax.block_until_ready(out)

    ref = _reference(text, emb_table, w_t, bias2d)
    assert out.shape == (batch, out_size)
    assert jnp.allclose(out, ref, atol=1e-5, rtol=1e-5), "mismatch vs reference"

    print("KERNEL_OK")
</pallas_src>

<mosaic_0001>
module attributes {stable_mosaic.version = 11 : i64} {
  func.func @_sentiment_kernel(%arg0: i32, %arg1: memref<8x8xi32, #tpu.memory_space<vmem>>, %arg2: memref<32x64xf32, #tpu.memory_space<vmem>>, %arg3: memref<32x128xf32, #tpu.memory_space<vmem>>, %arg4: memref<1x128xf32, #tpu.memory_space<vmem>>, %arg5: memref<8x128xf32, #tpu.memory_space<vmem>>) attributes {dimension_semantics = [#tpu.dimension_semantics<parallel>], iteration_bounds = array<i64: 1>, scalar_prefetch = 0 : i64, scratch_operands = 0 : i64, tpu.core_type = #tpu.core_type<tc>, window_params = [{transform_indices = @transform_0, window_bounds = array<i64: 8, 8>}, {pipeline_mode = #tpu.pipeline_mode<synchronous>, transform_indices = @transform_1, window_bounds = array<i64: 32, 64>}, {pipeline_mode = #tpu.pipeline_mode<synchronous>, transform_indices = @transform_2, window_bounds = array<i64: 32, 128>}, {pipeline_mode = #tpu.pipeline_mode<synchronous>, transform_indices = @transform_3, window_bounds = array<i64: 1, 128>}, {transform_indices = @transform_4, window_bounds = array<i64: 8, 128>}]} {
    %c0 = arith.constant 0 : index
    %c0_0 = arith.constant 0 : index
    %0 = vector.load %arg1[%c0, %c0_0] : memref<8x8xi32, #tpu.memory_space<vmem>>, vector<8x8xi32>
    %c0_1 = arith.constant 0 : index
    %c0_2 = arith.constant 0 : index
    %1 = vector.load %arg2[%c0_1, %c0_2] : memref<32x64xf32, #tpu.memory_space<vmem>>, vector<32x64xf32>
    %2 = tpu.iota {dimensions = array<i32: 1>} : vector<8x64xi32>
    %3 = vector.extract_strided_slice %0 {offsets = [0, 0], sizes = [8, 1], strides = [1, 1]} : vector<8x8xi32> to vector<8x1xi32>
    %4 = vector.broadcast %3 : vector<8x1xi32> to vector<8x64xi32>
    %5 = arith.cmpi eq, %4, %2 : vector<8x64xi32>
    %6 = vector.extract_strided_slice %0 {offsets = [0, 1], sizes = [8, 1], strides = [1, 1]} : vector<8x8xi32> to vector<8x1xi32>
    %7 = vector.broadcast %6 : vector<8x1xi32> to vector<8x64xi32>
    %8 = arith.cmpi eq, %7, %2 : vector<8x64xi32>
    %9 = arith.ori %5, %8 : vector<8x64xi1>
    %10 = vector.extract_strided_slice %0 {offsets = [0, 2], sizes = [8, 1], strides = [1, 1]} : vector<8x8xi32> to vector<8x1xi32>
    %11 = vector.broadcast %10 : vector<8x1xi32> to vector<8x64xi32>
    %12 = arith.cmpi eq, %11, %2 : vector<8x64xi32>
    %13 = arith.ori %9, %12 : vector<8x64xi1>
    %14 = vector.extract_strided_slice %0 {offsets = [0, 3], sizes = [8, 1], strides = [1, 1]} : vector<8x8xi32> to vector<8x1xi32>
    %15 = vector.broadcast %14 : vector<8x1xi32> to vector<8x64xi32>
    %16 = arith.cmpi eq, %15, %2 : vector<8x64xi32>
    %17 = arith.ori %13, %16 : vector<8x64xi1>
    %18 = vector.extract_strided_slice %0 {offsets = [0, 4], sizes = [8, 1], strides = [1, 1]} : vector<8x8xi32> to vector<8x1xi32>
    %19 = vector.broadcast %18 : vector<8x1xi32> to vector<8x64xi32>
    %20 = arith.cmpi eq, %19, %2 : vector<8x64xi32>
    %21 = arith.ori %17, %20 : vector<8x64xi1>
    %22 = vector.extract_strided_slice %0 {offsets = [0, 5], sizes = [8, 1], strides = [1, 1]} : vector<8x8xi32> to vector<8x1xi32>
    %23 = vector.broadcast %22 : vector<8x1xi32> to vector<8x64xi32>
    %24 = arith.cmpi eq, %23, %2 : vector<8x64xi32>
    %25 = arith.ori %21, %24 : vector<8x64xi1>
    %26 = vector.extract_strided_slice %0 {offsets = [0, 6], sizes = [8, 1], strides = [1, 1]} : vector<8x8xi32> to vector<8x1xi32>
    %27 = vector.broadcast %26 : vector<8x1xi32> to vector<8x64xi32>
    %28 = arith.cmpi eq, %27, %2 : vector<8x64xi32>
    %29 = arith.ori %25, %28 : vector<8x64xi1>
    %30 = vector.extract_strided_slice %0 {offsets = [0, 7], sizes = [8, 1], strides = [1, 1]} : vector<8x8xi32> to vector<8x1xi32>
    %31 = vector.broadcast %30 : vector<8x1xi32> to vector<8x64xi32>
    %32 = arith.cmpi eq, %31, %2 : vector<8x64xi32>
    %33 = arith.ori %29, %32 : vector<8x64xi1>
    %34 = vector.shape_cast %33 : vector<8x64xi1> to vector<8x1x64xi1>
    %35 = vector.shape_cast %1 : vector<32x64xf32> to vector<1x32x64xf32>
    %cst = arith.constant 0xFF800000 : f32
    %36 = vector.shape_cast %34 : vector<8x1x64xi1> to vector<8x1x64xi1>
    %37 = vector.broadcast %36 : vector<8x1x64xi1> to vector<8x32x64xi1>
    %38 = vector.shape_cast %35 : vector<1x32x64xf32> to vector<1x32x64xf32>
    %39 = vector.broadcast %38 : vector<1x32x64xf32> to vector<8x32x64xf32>
    %40 = vector.broadcast %cst : f32 to vector<8x32x64xf32>
    %41 = arith.select %37, %39, %40 : vector<8x32x64xi1>, vector<8x32x64xf32>
    %cst_3 = arith.constant dense<0xFF800000> : vector<8x32xf32>
    %42 = vector.multi_reduction <maximumf>, %41, %cst_3 [2] : vector<8x32x64xf32> to vector<8x32xf32>
    %c0_4 = arith.constant 0 : index
    %c0_5 = arith.constant 0 : index
    %43 = vector.load %arg3[%c0_4, %c0_5] : memref<32x128xf32, #tpu.memory_space<vmem>>, vector<32x128xf32>
    %cst_6 = arith.constant dense<0.000000e+00> : vector<8x128xf32>
    %44 = tpu.matmul %42, %43, %cst_6 {dimension_numbers = #tpu.dot_dimension_numbers<[1], [0], [0], [1], [0, 0, 1, 1], [], []>} : vector<8x32xf32>, vector<32x128xf32>, vector<8x128xf32> -> vector<8x128xf32>
    %c0_7 = arith.constant 0 : index
    %c0_8 = arith.constant 0 : index
    %45 = vector.load %arg4[%c0_7, %c0_8] : memref<1x128xf32, #tpu.memory_space<vmem>>, vector<1x128xf32>
    %46 = vector.broadcast %45 : vector<1x128xf32> to vector<8x128xf32>
    %47 = arith.addf %44, %46 : vector<8x128xf32>
    %c0_9 = arith.constant 0 : index
    %c0_10 = arith.constant 0 : index
    %48 = vector.load %arg5[%c0_9, %c0_10] : memref<8x128xf32, #tpu.memory_space<vmem>>, vector<8x128xf32>
    tpu.vector_store %arg5[%c0_9, %c0_10], %47 {strides = array<i32>} : memref<8x128xf32, #tpu.memory_space<vmem>>, vector<8x128xf32>,
    return
  }
  func.func @transform_0(%arg0: i32) -> (i32, i32) {
    %c0_i32 = arith.constant 0 : i32
    %c0_i32_0 = arith.constant 0 : i32
    return %arg0, %c0_i32 : i32, i32
  }
  func.func @transform_1(%arg0: i32) -> (i32, i32) {
    %c0_i32 = arith.constant 0 : i32
    %c0_i32_0 = arith.constant 0 : i32
    %c0_i32_1 = arith.constant 0 : i32
    return %c0_i32, %c0_i32_0 : i32, i32
  }
  func.func @transform_2(%arg0: i32) -> (i32, i32) {
    %c0_i32 = arith.constant 0 : i32
    %c0_i32_0 = arith.constant 0 : i32
    %c0_i32_1 = arith.constant 0 : i32
    return %c0_i32, %c0_i32_0 : i32, i32
  }
  func.func @transform_3(%arg0: i32) -> (i32, i32) {
    %c0_i32 = arith.constant 0 : i32
    %c0_i32_0 = arith.constant 0 : i32
    %c0_i32_1 = arith.constant 0 : i32
    return %c0_i32, %c0_i32_0 : i32, i32
  }
  func.func @transform_4(%arg0: i32) -> (i32, i32) {
    %c0_i32 = arith.constant 0 : i32
    %c0_i32_0 = arith.constant 0 : i32
    return %arg0, %c0_i32 : i32, i32
  }
}

</mosaic_0001>

<bundles_post_ra>
// kernel: tpu_custom_call.1
= control target key start
LH: loop header
LB: loop body
LE: loop exit
PB: predicated region body
PF: predicated region fallthrough
CT: control target
= control target key end

     0   :  { %9 = vsyncpa [#allocation3], 0  ;;  %s1196_s0 = inlined_call_operand.hbm [shape: s32[8,8], index: 0, kind: input, shape index: {}]   ;;  %s1197_s1 = inlined_call_operand.hbm [shape: f32[32,64], index: 1, kind: input, shape index: {}]   ;;  %s1198_s2 = inlined_call_operand.hbm [shape: f32[32,128], index: 2, kind: input, shape index: {}]   ;;  %s1199_s3 = inlined_call_operand.vmem [shape: f32[1,128], index: 3, kind: input, shape index: {}]   ;;  %s1200_s4 = inlined_call_operand.hbm [shape: f32[8,128], index: 4, kind: output, shape index: {}]  }
   0x1   :  { %10 = vsyncpa [#allocation6], 0 }
   0x2   :  { %11 = vsyncpa [#allocation4], 0  ;;  %s788_s15 = smov [#allocation5]   ;;  %s694_s19 = scalar_lea.hbm %s1197_s1, 512 }
   0x3   :  { %s27_s16 = sshll.u32 %s788_s15, 4  ;;  %p695_p0 = scmp.ne.s32.totalorder %s1197_s1, %s694_s19  ;;  %s28_s16 = int_to_ptr.vmem [resolvable:$true] %s27_s16 }
   0x4   :  { %p698_p1 = scmp.lt.u32.totalorder %s694_s19, %s1197_s1 }
   0x6   :  { %p700_p2 = pnand %p698_p1, %p695_p0 }
   0x8   :  { %703 = shalt.err (!%p700_p2)
}
   0x9   :  { %s704_s24 = scalar_lea.vmem %s28_s16, 512  ;;  %p709_p4 = scmp.lt.s32.totalorder %s28_s16, %s28_s16 }
   0xa   :  { %p705_p3 = scmp.ne.s32.totalorder %s28_s16, %s704_s24  ;;  %p710_p5 = scmp.lt.s32.totalorder %s704_s24, %s704_s24 }
   0xc   :  { %p711_p6 = por %p710_p5, %p709_p4 }
   0xe   :  { %p712_p7 = pnand %p711_p6, %p705_p3 }
  0x10   :  { %715 = shalt.err (!%p712_p7)
}
  0x11   :  { %s789_s25 = smov 128   ;;  %s790_s26 = smov 8  }
  0x12   :  { %33 = dma.hbm_to_vmem [thread:$0]  %s1197_s1, 512, %s28_s16, [#allocation6], %s789_s25, %s789_s25, %s790_s26  }
  0x13   :  { %s791_s29 = smov [#allocation2]   ;;  %s792_s5 = smov [#allocation7]  }
  0x14   :  { %s18_s30 = sshll.u32 %s791_s29, 4  ;;  %s39_s6 = sshll.u32 %s792_s5, 4  ;;  %s19_s30 = int_to_ptr.vmem [resolvable:$true] %s18_s30  ;;  %s40_s6 = int_to_ptr.vmem [resolvable:$true] %s39_s6 }
  0x15   :  { %s716_s9 = scalar_lea.hbm %s1196_s0, 128 }
  0x16   :  { %p717_p8 = scmp.ne.s32.totalorder %s1196_s0, %s716_s9  ;;  %p720_p9 = scmp.lt.u32.totalorder %s716_s9, %s1196_s0 }
  0x18   :  { %p722_p10 = pnand %p720_p9, %p717_p8 }
  0x1a   :  { %725 = shalt.err (!%p722_p10)
}
  0x1b   :  { %s726_s1 = scalar_lea.vmem %s19_s30, 128  ;;  %p731_p12 = scmp.lt.s32.totalorder %s19_s30, %s19_s30 }
  0x1c   :  { %p727_p11 = scmp.ne.s32.totalorder %s19_s30, %s726_s1  ;;  %p732_p13 = scmp.lt.s32.totalorder %s726_s1, %s726_s1 }
  0x1e   :  { %p733_p0 = por %p732_p13, %p731_p12 }
  0x20   :  { %p734_p1 = pnand %p733_p0, %p727_p11 }
  0x22   :  { %737 = shalt.err (!%p734_p1)
}
  0x23   :  { %21 = dma.hbm_to_vmem [thread:$0]  %s1196_s0, 128, %s19_s30, [#allocation3]  }
  0x24   :  { %s738_s18 = scalar_lea.hbm %s1198_s2, 512 }
  0x25   :  { %p739_p2 = scmp.ne.s32.totalorder %s1198_s2, %s738_s18  ;;  %p742_p3 = scmp.lt.u32.totalorder %s738_s18, %s1198_s2 }
  0x27   :  { %p744_p4 = pnand %p742_p3, %p739_p2 }
  0x29   :  { %747 = shalt.err (!%p744_p4)
}
  0x2a   :  { %s748_s23 = scalar_lea.vmem %s40_s6, 512  ;;  %p753_p6 = scmp.lt.s32.totalorder %s40_s6, %s40_s6 }
  0x2b   :  { %p749_p5 = scmp.ne.s32.totalorder %s40_s6, %s748_s23  ;;  %p754_p7 = scmp.lt.s32.totalorder %s748_s23, %s748_s23 }
  0x2d   :  { %p755_p8 = por %p754_p7, %p753_p6 }
  0x2f   :  { %p756_p9 = pnand %p755_p8, %p749_p5 }
  0x31   :  { %759 = shalt.err (!%p756_p9)
}
  0x32   :  { %45 = dma.hbm_to_vmem [thread:$0]  %s1198_s2, 512, %s40_s6, [#allocation6], %s789_s25, %s789_s25, %s790_s26  }
  0x33   :  { %782 = dma.done.wait [#allocation3], 128  }
  0x34   :  { %783 = vsyncadd [#allocation3], 4294967168 }
  0x35   :  { %784 = dma.done.wait [#allocation6], 1024  }
  0x36   :  { %785 = vsyncadd [#allocation6], 4294966272  ;;  %v793_v0 = vmov 2   ;;  %v794_v1 = vmov 0   ;;  %v57_v2 = vld [vmem:[#allocation2] sm:$0xff]  ;;  %v795_v3 = vmov 3   ;;  %v62_v11 = vlaneseq }
  0x37   :  { %687 = vset.pattern.permute.xlu1 %v793_v0  ;;  %685 = vset.pattern.permute.xlu0 %v794_v1  ;;  %v796_v4 = vmov 1   ;;  %v797_v5 = vmov 4   ;;  %v798_v6 = vmov 5   ;;  %v799_v7 = vmov 6   ;;  %v898_v34 = vld [vmem:[#allocation5 + $0x8] sm:$0xff]  ;;  %v901_v36 = vld [vmem:[#allocation5] sm:$0xff] }
  0x38   :  { %74 = vperm.xlu1 %687, %v57_v2   ;;  %65 = vperm.xlu0 %685, %v57_v2   ;;  %v800_v8 = vmov 7   ;;  %v874_v12 = vand.u32 127, %v62_v11  ;;  %v801_v16 = vmov 1966171168   ;;  %v881_v21 = vshrl.u32 %v62_v11, 7  ;;  %v909_v40 = vld [vmem:[#allocation5 + $0x10] sm:$0xff] }
  0x39   :  { %v106_v17 = vunpack.c.l.s4 %v801_v16  ;;  %v933_v50 = vld [vmem:[#allocation5 + $0x18] sm:$0xff]  ;;  %s805_s26 = smov [#allocation8]  }
  0x3a   :  { %v893_v29 = vsub.s32 0, %v881_v21  ;;  %s633_s27 = sshll.u32 %s805_s26, 4  ;;  %s634_s27 = int_to_ptr.vmem [resolvable:$true] %s633_s27 }
  0x3b   :  { %v107_v20 = vunpack.c.0.s8 %v106_v17  ;;  %s760_s28 = scalar_lea.vmem %s634_s27, 128  ;;  %p765_p11 = scmp.lt.s32.totalorder %s634_s27, %s634_s27 }
  0x3c   :  { %688 = vset.pattern.permute.xlu1 %v795_v3  ;;  %686 = vset.pattern.permute.xlu0 %v796_v4  ;;  %p761_p10 = scmp.ne.s32.totalorder %s634_s27, %s760_s28  ;;  %p766_p12 = scmp.lt.s32.totalorder %s760_s28, %s760_s28 }
  0x3d   :  { %79 = vperm.xlu1 %688, %v57_v2   ;;  %69 = vperm.xlu0 %686, %v57_v2   ;;  %v886_v22 = vsub.s32 %v107_v20, %v881_v21 }
  0x3e   :  { %p767_p13 = por %p766_p12, %p765_p11 }
  0x40   :  { %p768_p0 = pnand %p767_p13, %p761_p10 }
  0x41   :  { %689 = vset.pattern.permute.xlu1 %v797_v5  ;;  %690 = vset.pattern.permute.xlu0 %v798_v6 }
  0x42   :  { %84 = vperm.xlu1 %689, %v57_v2   ;;  %89 = vperm.xlu0 %690, %v57_v2  }
  0x46   :  { %691 = vset.pattern.permute.xlu1 %v799_v7  ;;  %693 = vset.pattern.permute.xlu0 %v800_v8 }
  0x47   :  { %94 = vperm.xlu1 %691, %v57_v2  }
  0x4b   :  { %692 = vset.pattern.permute.xlu1 %v800_v8 }
  0x4c   :  { %99 = vperm.xlu1 %692, %v57_v2  }
  0xb7   :  { %v75_v9 = vpop.permute.xlu1 %74  ;;  %v66_v10 = vpop.permute.xlu0 %65 }
  0xb8   :  { %vm67_vm0 = vcmp.eq.s32.totalorder %v66_v10, %v874_v12  ;;  %vm76_vm3 = vcmp.eq.s32.totalorder %v75_v9, %v874_v12 }
  0xbc   :  { %v80_v13 = vpop.permute.xlu1 %79  ;;  %v70_v14 = vpop.permute.xlu0 %69 }
  0xbd   :  { %vm71_vm1 = vcmp.eq.s32.totalorder %v70_v14, %v874_v12  ;;  %vm81_vm6 = vcmp.eq.s32.totalorder %v80_v13, %v874_v12 }
  0xbe   :  { %vm72_vm2 = vmor %vm67_vm0, %vm71_vm1 }
  0xbf   :  { %vm77_vm4 = vmor %vm72_vm2, %vm76_vm3  ;;  %vm241_vm2 = vcmask 523264  }
  0xc0   :  { %vm82_vm7 = vmor %vm77_vm4, %vm81_vm6 }
  0xc1   :  { %v85_v15 = vpop.permute.xlu1 %84  ;;  %v90_v18 = vpop.permute.xlu0 %89 }
  0xc2   :  { %vm86_vm5 = vcmp.eq.s32.totalorder %v85_v15, %v874_v12  ;;  %vm91_vm9 = vcmp.eq.s32.totalorder %v90_v18, %v874_v12 }
  0xc3   :  { %vm87_vm8 = vmor %vm82_vm7, %vm86_vm5 }
  0xc4   :  { %vm92_vm11 = vmor %vm87_vm8, %vm91_vm9 }
  0xc6   :  { %v95_v19 = vpop.permute.xlu1 %94 }
  0xc7   :  { %vm96_vm10 = vcmp.eq.s32.totalorder %v95_v19, %v874_v12 }
  0xc8   :  { %vm97_vm12 = vmor %vm92_vm11, %vm96_vm10 }
  0xcb   :  { %v100_v23 = vpop.permute.xlu1 %99 }
  0xcc   :  { %vm101_vm13 = vcmp.eq.s32.totalorder %v100_v23, %v874_v12 }
  0xcd   :  { %vm102_vm14 = vmor %vm97_vm12, %vm101_vm13 }
  0xce   :  { %v103_v24 = vsel %vm102_vm14, 1, %v794_v1 }
  0xcf   :  { %v111_v25 = vrot.slane %v103_v24, %v886_v22  ;;  %v104_v28 = vcombine.high %v103_v24, %v103_v24 }
  0xd1   :  { %v119_v26 = vcombine.high %v111_v25, %v111_v25  ;;  %v127_v27 = vrot.slane %v111_v25, %v886_v22  ;;  %v118_v33 = vrot.slane %v104_v28, %v886_v22 }
  0xd3   :  { %v141_v30 = vrot.slane %v119_v26, %v886_v22  ;;  %v149_v31 = vcombine.high %v127_v27, %v127_v27  ;;  %vm153_vm15 = vcmp.ne.s32.totalorder %v127_v27, 0  ;;  %v923_v45 = vrot.slane %v118_v33, %v886_v22 }
  0xd4   :  { %v161_v32 = vsel %vm153_vm15, 1, %v794_v1  ;;  %v120_v0 = vcombine.high %v118_v33, %v118_v33 }
  0xd5   :  { %vm154_vm0 = vcmp.ne.s32.totalorder %v141_v30, 0  ;;  %v172_v35 = vrot.slane %v161_v32, %v893_v29  ;;  %vm155_vm1 = vcmp.ne.s32.totalorder %v149_v31, 0  ;;  %vm157_vm5 = vcmp.ne.s32.totalorder %v923_v45, 0 }
  0xd6   :  { %v162_v37 = vsel %vm154_vm0, 1, %v794_v1  ;;  %v163_v44 = vsel %vm155_vm1, 1, %v794_v1  ;;  %v165_v57 = vsel %vm157_vm5, 1, %v794_v1  ;;  %v151_v60 = vcombine.high %v141_v30, %v141_v30 }
  0xd7   :  { %v176_v38 = vrot.slane %v162_v37, %v893_v29  ;;  %vm905_vm3 = vcmp.eq.s32.totalorder %v172_v35, 1  ;;  %v180_v51 = vrot.slane %v163_v44, %v893_v29  ;;  %v188_v63 = vrot.slane %v165_v57, %v893_v29 }
  0xd8   :  { %v210_v41 = vsel %vm905_vm3, %v898_v34, -inf  ;;  %v209_v42 = vsel %vm905_vm3, %v901_v36, -inf  ;;  %v211_v48 = vsel %vm905_vm3, %v909_v40, -inf  ;;  %v212_v54 = vsel %vm905_vm3, %v933_v50, -inf }
  0xd9   :  { %vm917_vm4 = vcmp.eq.s32.totalorder %v176_v38, 1  ;;  %v245_v46 = vsel %vm241_vm2, %v210_v41, -inf  ;;  %v242_v47 = vsel %vm241_vm2, %v209_v42, -inf  ;;  %v248_v52 = vsel %vm241_vm2, %v211_v48, -inf }
  0xda   :  { %246 = vmax.xlane.f32.xlu1 %v245_v46  ;;  %243 = vmax.xlane.f32.xlu0 %v242_v47  ;;  %v213_v49 = vsel %vm917_vm4, %v901_v36, -inf  ;;  %v214_v55 = vsel %vm917_vm4, %v898_v34, -inf  ;;  %vm945_vm6 = vcmp.eq.s32.totalorder %v180_v51, 1  ;;  %v251_v58 = vsel %vm241_vm2, %v212_v54, -inf }
  0xdb   :  { %v254_v53 = vsel %vm241_vm2, %v213_v49, -inf  ;;  %v257_v59 = vsel %vm241_vm2, %v214_v55, -inf  ;;  %v217_v61 = vsel %vm945_vm6, %v901_v36, -inf  ;;  %v215_v62 = vsel %vm917_vm4, %v909_v40, -inf }
  0xdc   :  { %v266_v2 = vsel %vm241_vm2, %v217_v61, -inf  ;;  %v260_v3 = vsel %vm241_vm2, %v215_v62, -inf  ;;  %vm156_vm7 = vcmp.ne.s32.totalorder %v151_v60, 0  ;;  %v219_v4 = vsel %vm945_vm6, %v909_v40, -inf }
  0xdd   :  { %v218_v5 = vsel %vm945_vm6, %v898_v34, -inf  ;;  %vm967_vm8 = vcmp.eq.s32.totalorder %v188_v63, 1  ;;  %v164_v7 = vsel %vm156_vm7, 1, %v794_v1  ;;  %v148_v8 = vrot.slane %v120_v0, %v886_v22 }
  0xde   :  { %249 = vmax.xlane.f32.xlu1 %v248_v52  ;;  %255 = vmax.xlane.f32.xlu0 %v254_v53  ;;  %v272_v9 = vsel %vm241_vm2, %v219_v4, -inf  ;;  %v269_v10 = vsel %vm241_vm2, %v218_v5, -inf  ;;  %v216_v11 = vsel %vm917_vm4, %v933_v50, -inf  ;;  %v226_v13 = vsel %vm967_vm8, %v898_v34, -inf }
  0xdf   :  { %v184_v14 = vrot.slane %v164_v7, %v893_v29  ;;  %v263_v15 = vsel %vm241_vm2, %v216_v11, -inf  ;;  %v293_v16 = vsel %vm241_vm2, %v226_v13, -inf  ;;  %vm158_vm9 = vcmp.ne.s32.totalorder %v148_v8, 0  ;;  %v340_v13 = vld [vmem:[#allocation7 + $0x10] sm:$0xff] }
  0xe0   :  { %v220_v17 = vsel %vm945_vm6, %v933_v50, -inf  ;;  %v227_v18 = vsel %vm967_vm8, %v909_v40, -inf  ;;  %v166_v20 = vsel %vm158_vm9, 1, %v794_v1  ;;  %v150_v24 = vcombine.high %v923_v45, %v923_v45 }
  0xe1   :  { %vm990_vm10 = vcmp.eq.s32.totalorder %v184_v14, 1  ;;  %v275_v22 = vsel %vm241_vm2, %v220_v17, -inf  ;;  %v296_v23 = vsel %vm241_vm2, %v227_v18, -inf  ;;  %v225_v26 = vsel %vm967_vm8, %v901_v36, -inf  ;;  %v341_v14 = vld [vmem:[#allocation7 + $0x18] sm:$0xff] }
  0xe2   :  { %252 = vmax.xlane.f32.xlu1 %v251_v58  ;;  %258 = vmax.xlane.f32.xlu0 %v257_v59  ;;  %v222_v25 = vsel %vm990_vm10, %v898_v34, -inf  ;;  %v192_v27 = vrot.slane %v166_v20, %v893_v29  ;;  %v290_v30 = vsel %vm241_vm2, %v225_v26, -inf  ;;  %vm159_vm11 = vcmp.ne.s32.totalorder %v150_v24, 0 }
  0xe3   :  { %v281_v28 = vsel %vm241_vm2, %v222_v25, -inf  ;;  %v223_v31 = vsel %vm990_vm10, %v909_v40, -inf  ;;  %v228_v32 = vsel %vm967_vm8, %v933_v50, -inf  ;;  %v167_v35 = vsel %vm159_vm11, 1, %v794_v1 }
  0xe4   :  { %vm1014_vm12 = vcmp.eq.s32.totalorder %v192_v27, 1  ;;  %v284_v37 = vsel %vm241_vm2, %v223_v31, -inf  ;;  %v299_v38 = vsel %vm241_vm2, %v228_v32, -inf  ;;  %v152_v39 = vcombine.high %v148_v8, %v148_v8 }
  0xe5   :  { %v221_v41 = vsel %vm990_vm10, %v901_v36, -inf  ;;  %v230_v42 = vsel %vm1014_vm12, %v898_v34, -inf  ;;  %v196_v43 = vrot.slane %v167_v35, %v893_v29  ;;  %v224_v46 = vsel %vm990_vm10, %v933_v50, -inf }
  0xe6   :  { %267 = vmax.xlane.f32.xlu1 %v266_v2  ;;  %261 = vmax.xlane.f32.xlu0 %v260_v3  ;;  %v278_v44 = vsel %vm241_vm2, %v221_v41, -inf  ;;  %v305_v45 = vsel %vm241_vm2, %v230_v42, -inf  ;;  %vm160_vm13 = vcmp.ne.s32.totalorder %v152_v39, 0  ;;  %v231_v47 = vsel %vm1014_vm12, %v909_v40, -inf }
  0xe7   :  { %vm1036_vm14 = vcmp.eq.s32.totalorder %v196_v43, 1  ;;  %v168_v49 = vsel %vm160_vm13, 1, %v794_v1  ;;  %v287_v51 = vsel %vm241_vm2, %v224_v46, -inf  ;;  %v308_v52 = vsel %vm241_vm2, %v231_v47, -inf }
  0xe8   :  { %v234_v53 = vsel %vm1036_vm14, %v898_v34, -inf  ;;  %v229_v54 = vsel %vm1014_vm12, %v901_v36, -inf  ;;  %v200_v55 = vrot.slane %v168_v49, %v893_v29  ;;  %v235_v57 = vsel %vm1036_vm14, %v909_v40, -inf }
  0xe9   :  { %v317_v56 = vsel %vm241_vm2, %v234_v53, -inf  ;;  %v302_v1 = vsel %vm241_vm2, %v229_v54, -inf  ;;  %v233_v58 = vsel %vm1036_vm14, %v901_v36, -inf  ;;  %v320_v29 = vsel %vm241_vm2, %v235_v57, -inf }
  0xea   :  { %273 = vmax.xlane.f32.xlu1 %v272_v9  ;;  %270 = vmax.xlane.f32.xlu0 %v269_v10  ;;  %vm1058_vm15 = vcmp.eq.s32.totalorder %v200_v55, 1  ;;  %v314_v60 = vsel %vm241_vm2, %v233_v58, -inf  ;;  %v232_v61 = vsel %vm1014_vm12, %v933_v50, -inf  ;;  %v236_v2 = vsel %vm1036_vm14, %v933_v50, -inf  ;;  %v339_v9 = vld [vmem:[#allocation7 + $0x8] sm:$0xff] }
  0xeb   :  { %v238_v62 = vsel %vm1058_vm15, %v898_v34, -inf  ;;  %v311_v63 = vsel %vm241_vm2, %v232_v61, -inf  ;;  %v239_v3 = vsel %vm1058_vm15, %v909_v40, -inf  ;;  %v323_v4 = vsel %vm241_vm2, %v236_v2, -inf  ;;  %v338_v40 = vld [vmem:[#allocation7] sm:$0xff] }
  0xec   :  { %v329_v0 = vsel %vm241_vm2, %v238_v62, -inf  ;;  %v332_v5 = vsel %vm241_vm2, %v239_v3, -inf  ;;  %v237_v34 = vsel %vm1058_vm15, %v901_v36, -inf  ;;  %v240_v7 = vsel %vm1058_vm15, %v933_v50, -inf }
  0xed   :  { %v326_v6 = vsel %vm241_vm2, %v237_v34, -inf  ;;  %v335_v8 = vsel %vm241_vm2, %v240_v7, -inf  ;;  %v802_v10 = vmov 0.0|0.0   ;;  %v662_v11 = vpack.c.bf16 %v339_v9, %v338_v40 }
  0xee   :  { %264 = vmax.xlane.f32.xlu0 %v263_v15  ;;  %294 = vmax.xlane.f32.xlu1 %v293_v16  ;;  %v665_v36 = vpack.c.bf16 %v341_v14, %v340_v13  ;;  %vm803_vm0 = vmmov 0   ;;  %v804_v15 = vmov 0.0   ;;  %v385_v42 = vadd.s32 4294967288, %v874_v12 }
  0xef   :  { %661 = vmatprep.subr.bf16.mxu0 %v802_v10  ;;  %658 = vmatprep.mubr.msk.f32.mxu0 %vm803_vm0, %v804_v15  ;;  %v392_v43 = vadd.s32 4294967280, %v874_v12  ;;  %v1108_v48 = vsub.s32 %v874_v12, %v881_v21  ;;  %vm390_vm1 = vcmask 130112   ;;  %vm397_vm2 = vcmask 195712  }
  0xf0   :  { %663 = vmatpush3.bf16.msra.mxu0 %v662_v11  ;;  %v1104_v47 = vsub.s32 %v385_v42, %v881_v21  ;;  %vm404_vm3 = vcmask 261312   ;;  %vm539_vm4 = vcmask 1041409   ;;  %vm541_vm5 = vcmask 1042434  }
  0xf1   :  { %664 = vmatprep.subr.bf16.mxu0 %v802_v10  ;;  %v1111_v49 = vsub.s32 %v392_v43, %v881_v21  ;;  %vm543_vm6 = vcmask 1043459   ;;  %vm545_vm7 = vcmask 1044484   ;;  %vm547_vm8 = vcmask 1045509  }
  0xf2   :  { %276 = vmax.xlane.f32.xlu0 %v275_v22  ;;  %297 = vmax.xlane.f32.xlu1 %v296_v23  ;;  %vm549_vm9 = vcmask 1046534   ;;  %vm551_vm10 = vcmask 1047559   ;;  %vm553_vm11 = vcmask 261120  }
  0xf4   :  { %666 = vmatpush3.bf16.msra.mxu0 %v665_v36 }
  0xf6   :  { %282 = vmax.xlane.f32.xlu1 %v281_v28  ;;  %291 = vmax.xlane.f32.xlu0 %v290_v30 }
  0xfa   :  { %285 = vmax.xlane.f32.xlu1 %v284_v37  ;;  %300 = vmax.xlane.f32.xlu0 %v299_v38 }
  0xfe   :  { %279 = vmax.xlane.f32.xlu0 %v278_v44  ;;  %306 = vmax.xlane.f32.xlu1 %v305_v45  ;;  %v399_v44 = vadd.s32 4294967272, %v874_v12 }
 0x102   :  { %288 = vmax.xlane.f32.xlu0 %v287_v51  ;;  %309 = vmax.xlane.f32.xlu1 %v308_v52  ;;  %v1114_v51 = vsub.s32 %v399_v44, %v881_v21 }
 0x106   :  { %318 = vmax.xlane.f32.xlu1 %v317_v56  ;;  %303 = vmax.xlane.f32.xlu0 %v302_v1 }
 0x10a   :  { %321 = vmax.xlane.f32.xlu1 %v320_v29  ;;  %315 = vmax.xlane.f32.xlu0 %v314_v60 }
 0x10e   :  { %312 = vmax.xlane.f32.xlu0 %v311_v63  ;;  %330 = vmax.xlane.f32.xlu1 %v329_v0 }
 0x112   :  { %324 = vmax.xlane.f32.xlu0 %v323_v4  ;;  %333 = vmax.xlane.f32.xlu1 %v332_v5 }
 0x116   :  { %327 = vmax.xlane.f32.xlu0 %v326_v6 }
 0x11a   :  { %336 = vmax.xlane.f32.xlu0 %v335_v8 }
 0x167   :  { %v247_v16 = vpop.xlane.xlu1 %246  ;;  %v244_v17 = vpop.xlane.xlu0 %243 }
 0x168   :  { %v389_v54 = vrot.slane %v247_v16, %v1104_v47  ;;  %v384_v55 = vrot.slane %v244_v17, %v1108_v48 }
 0x16a   :  { %v391_v63 = vsel %vm390_vm1, %v389_v54, %v384_v55 }
 0x16b   :  { %v250_v50 = vpop.xlane.xlu1 %249  ;;  %v256_v18 = vpop.xlane.xlu0 %255 }
 0x16c   :  { %v409_v12 = vrot.slane %v256_v18, %v1108_v48  ;;  %v396_v21 = vrot.slane %v250_v50, %v1111_v49 }
 0x16e   :  { %v398_v7 = vsel %vm397_vm2, %v396_v21, %v391_v63  ;;  %v643_v21 = vld [vmem:[%s1199_s3] ss:$0 sm:$0xff] }
 0x16f   :  { %v253_v19 = vpop.xlane.xlu1 %252  ;;  %v259_v20 = vpop.xlane.xlu0 %258 }
 0x170   :  { %v413_v52 = vrot.slane %v259_v20, %v1104_v47  ;;  %v403_v29 = vrot.slane %v253_v19, %v1114_v51 }
 0x172   :  { %v414_v60 = vsel %vm390_vm1, %v413_v52, %v409_v12  ;;  %v405_v11 = vsel %vm404_vm3, %v403_v29, %v398_v7 }
 0x173   :  { %v268_v22 = vpop.xlane.xlu1 %267  ;;  %v262_v23 = vpop.xlane.xlu0 %261 }
 0x174   :  { %v418_v56 = vrot.slane %v262_v23, %v1111_v49  ;;  %v428_v61 = vrot.slane %v268_v22, %v1108_v48 }
 0x176   :  { %v419_v0 = vsel %vm397_vm2, %v418_v56, %v414_v60 }
 0x177   :  { %v1088_v24 = vpop.xlane.xlu1 %273  ;;  %v271_v25 = vpop.xlane.xlu0 %270 }
 0x178   :  { %v432_v57 = vrot.slane %v271_v25, %v1104_v47  ;;  %v437_v2 = vrot.slane %v1088_v24, %v1111_v49 }
 0x17a   :  { %v433_v4 = vsel %vm390_vm1, %v432_v57, %v428_v61 }
 0x17b   :  { %v265_v26 = vpop.xlane.xlu0 %264  ;;  %v1090_v27 = vpop.xlane.xlu1 %294  ;;  %v438_v17 = vsel %vm397_vm2, %v437_v2, %v433_v4 }
 0x17c   :  { %v423_v58 = vrot.slane %v265_v26, %v1114_v51  ;;  %v470_v13 = vrot.slane %v1090_v27, %v1104_v47 }
 0x17e   :  { %v424_v5 = vsel %vm404_vm3, %v423_v58, %v419_v0 }
 0x17f   :  { %v1092_v28 = vpop.xlane.xlu0 %276  ;;  %v1094_v30 = vpop.xlane.xlu1 %297  ;;  %v540_v16 = vsel %vm539_vm4, %v424_v5, %v405_v11 }
 0x180   :  { %v442_v34 = vrot.slane %v1092_v28, %v1114_v51 }
 0x182   :  { %v443_v18 = vsel %vm404_vm3, %v442_v34, %v438_v17 }
 0x183   :  { %v283_v31 = vpop.xlane.xlu1 %282  ;;  %v292_v32 = vpop.xlane.xlu0 %291 }
 0x184   :  { %v451_v3 = vrot.slane %v283_v31, %v1104_v47  ;;  %v466_v6 = vrot.slane %v292_v32, %v1108_v48 }
 0x186   :  { %v471_v19 = vsel %vm390_vm1, %v470_v13, %v466_v6 }
 0x187   :  { %v286_v33 = vpop.xlane.xlu1 %285  ;;  %v1096_v35 = vpop.xlane.xlu0 %300 }
 0x188   :  { %v456_v14 = vrot.slane %v286_v33, %v1111_v49  ;;  %v480_v27 = vrot.slane %v1096_v35, %v1114_v51 }
 0x18b   :  { %v280_v37 = vpop.xlane.xlu0 %279  ;;  %v307_v38 = vpop.xlane.xlu1 %306 }
 0x18c   :  { %v447_v59 = vrot.slane %v280_v37, %v1108_v48  ;;  %v489_v50 = vrot.slane %v307_v38, %v1104_v47  ;;  %v542_v37 = vsel %vm541_vm5, %v443_v18, %v540_v16  ;;  %v475_v38 = vrot.slane %v1094_v30, %v1111_v49 }
 0x18e   :  { %v452_v8 = vsel %vm390_vm1, %v451_v3, %v447_v59 }
 0x18f   :  { %v289_v39 = vpop.xlane.xlu0 %288  ;;  %v1098_v41 = vpop.xlane.xlu1 %309  ;;  %v457_v20 = vsel %vm397_vm2, %v456_v14, %v452_v8 }
 0x190   :  { %v461_v40 = vrot.slane %v289_v39, %v1114_v51  ;;  %v494_v28 = vrot.slane %v1098_v41, %v1111_v49  ;;  %v476_v41 = vsel %vm397_vm2, %v475_v38, %v471_v19 }
 0x191   :  { %v481_v30 = vsel %vm404_vm3, %v480_v27, %v476_v41 }
 0x192   :  { %v462_v23 = vsel %vm404_vm3, %v461_v40, %v457_v20 }
 0x193   :  { %v319_v45 = vpop.xlane.xlu1 %318  ;;  %v304_v46 = vpop.xlane.xlu0 %303  ;;  %v544_v35 = vsel %vm543_vm6, %v462_v23, %v542_v37 }
 0x194   :  { %v485_v9 = vrot.slane %v304_v46, %v1108_v48  ;;  %v508_v22 = vrot.slane %v319_v45, %v1104_v47  ;;  %v546_v54 = vsel %vm545_vm7, %v481_v30, %v544_v35 }
 0x196   :  { %v490_v24 = vsel %vm390_vm1, %v489_v50, %v485_v9 }
 0x197   :  { %v316_v53 = vpop.xlane.xlu0 %315  ;;  %v322_v1 = vpop.xlane.xlu1 %321  ;;  %v495_v44 = vsel %vm397_vm2, %v494_v28, %v490_v24 }
 0x198   :  { %v504_v36 = vrot.slane %v316_v53, %v1108_v48  ;;  %v513_v25 = vrot.slane %v322_v1, %v1111_v49 }
 0x19a   :  { %v509_v31 = vsel %vm390_vm1, %v508_v22, %v504_v36 }
 0x19b   :  { %v313_v62 = vpop.xlane.xlu0 %312  ;;  %v331_v10 = vpop.xlane.xlu1 %330  ;;  %v514_v46 = vsel %vm397_vm2, %v513_v25, %v509_v31 }
 0x19c   :  { %v499_v26 = vrot.slane %v313_v62, %v1114_v51  ;;  %v527_v39 = vrot.slane %v331_v10, %v1104_v47 }
 0x19e   :  { %v500_v45 = vsel %vm404_vm3, %v499_v26, %v495_v44 }
 0x19f   :  { %v325_v15 = vpop.xlane.xlu0 %324  ;;  %v334_v42 = vpop.xlane.xlu1 %333  ;;  %v548_v56 = vsel %vm547_vm8, %v500_v45, %v546_v54 }
 0x1a0   :  { %v518_v32 = vrot.slane %v325_v15, %v1114_v51 }
 0x1a2   :  { %v519_v47 = vsel %vm404_vm3, %v518_v32, %v514_v46 }
 0x1a3   :  { %v328_v33 = vpop.xlane.xlu0 %327  ;;  %v550_v57 = vsel %vm549_vm9, %v519_v47, %v548_v56 }
 0x1a4   :  { %v523_v43 = vrot.slane %v328_v33, %v1108_v48  ;;  %v532_v48 = vrot.slane %v334_v42, %v1111_v49 }
 0x1a6   :  { %v528_v52 = vsel %vm390_vm1, %v527_v39, %v523_v43 }
 0x1a7   :  { %v337_v53 = vpop.xlane.xlu0 %336  ;;  %v533_v1 = vsel %vm397_vm2, %v532_v48, %v528_v52 }
 0x1a8   :  { %v537_v55 = vrot.slane %v337_v53, %v1114_v51 }
 0x1aa   :  { %v538_v12 = vsel %vm404_vm3, %v537_v55, %v533_v1 }
 0x1ab   :  { %v552_v58 = vsel %vm551_vm10, %v538_v12, %v550_v57 }
 0x1ac   :  { %659 = vmatmul.mubr.msk.f32.vlgmr.msra.gmra.mrb[0].mxu0 %vm553_vm11, %v552_v58 }
 0x27f   :  { %v622_v49 = vpop.f32.mrb[0].mxu0 }
 0x280   :  { %v623_v59 = vadd.f32 %v643_v21, %v622_v49  ;;  %v660_v29 = vpop.f32.mrb[1].mxu0 }
 0x282   :  { %626 = vst [vmem:[#allocation8] sm:$0xff] %v623_v59 }
 0x283   :  { %771 = shalt.err (!%p768_p0)
}
 0x284   :  { %s772_s5 = scalar_lea.hbm %s1200_s4, 128 }
 0x285   :  { %p773_p1 = scmp.ne.s32.totalorder %s1200_s4, %s772_s5  ;;  %p776_p2 = scmp.lt.u32.totalorder %s772_s5, %s1200_s4 }
 0x287   :  { %p778_p3 = pnand %p776_p2, %p773_p1 }
 0x289   :  { %781 = shalt.err (!%p778_p3)
}
 0x28a   :  { %636 = dma.vmem_to_hbm [thread:$0]  %s634_s27, 128, %s1200_s4, [#allocation4]  }
 0x28b   :  { %786 = dma.done.wait [#allocation4], 128  }
 0x28c   :  { %787 = vsyncadd [#allocation4], 4294967168 }
 0x28d   :  { %640 = vsyncpa [#allocation3], 1 }
 0x28e   :  { %641 = vsyncpa [#allocation6], 1 }
 0x28f   :  { %642 = vsyncpa [#allocation4], 1 }

</bundles_post_ra>
